<compile_context>
chip_gen: v7x
topology: tpu7x:2x2x1
jax: 0.10.0
libtpu: 0.0.40
codegen_flags: <defaults>
</compile_context>

<pallas_src>
import jax
import jax.numpy as jnp
from jax.experimental import pallas as pl
from jax.experimental.pallas import tpu as pltpu

STATE_DIM = 52
ACTION_DIM = 2
HIDDEN = 256
K_PAD = 64           # state_dim zero-padded to an aligned K for the first matmul
HEAD_PAD = 128       # single lane-dense head slab: mu in [0:2], log_std in [8:10]
MU_OFF = 0
LS_OFF = 8
TB_MAX = 2048        # max batch-tile rows
MIN_LOG_STD = -20.0
MAX_LOG_STD = 2.0


def _round_up(n, m):
    return (n + m - 1) // m * m


def actor_kernel(x_ref, w1_ref, b1_ref, w2_ref, b2_ref, wh_ref, bh_ref, head_ref):
    # MXU operands may be bf16 (or f32); accumulation is always f32.
    x = x_ref[...]

    # l1 + ReLU
    h1 = jnp.dot(x, w1_ref[...], preferred_element_type=jnp.float32) + b1_ref[...]
    h1 = jnp.maximum(h1, 0.0)

    # l2 + ReLU
    h2 = jnp.dot(h1.astype(w2_ref.dtype), w2_ref[...],
                 preferred_element_type=jnp.float32) + b2_ref[...]
    h2 = jnp.maximum(h2, 0.0)

    # fused mu / log_std head: one (HIDDEN, HEAD_PAD) matmul, raw result out.
    head = jnp.dot(h2.astype(wh_ref.dtype), wh_ref[...],
                   preferred_element_type=jnp.float32) + bh_ref[...]
    head_ref[...] = head.astype(head_ref.dtype)


def actor_forward(x, params, use_bf16=True):
    """x: (B, STATE_DIM) f32. Returns (mu, std), each (B, ACTION_DIM) f32."""
    w1, b1, w2, b2, wmu, bmu, wls, bls = params
    B = x.shape[0]
    in_dtype = jnp.bfloat16 if use_bf16 else jnp.float32

    # ---- pack / pad parameters (tiny ops, done once by XLA outside the kernel) ----
    w1p = jnp.zeros((K_PAD, HIDDEN), jnp.float32).at[:STATE_DIM].set(w1)
    wh = jnp.zeros((HIDDEN, HEAD_PAD), jnp.float32)
    wh = wh.at[:, MU_OFF:MU_OFF + ACTION_DIM].set(wmu)
    wh = wh.at[:, LS_OFF:LS_OFF + ACTION_DIM].set(wls)
    bh = jnp.zeros((1, HEAD_PAD), jnp.float32)
    bh = bh.at[:, MU_OFF:MU_OFF + ACTION_DIM].set(bmu)
    bh = bh.at[:, LS_OFF:LS_OFF + ACTION_DIM].set(bls)

    w1p = w1p.astype(in_dtype)
    w2c = w2.astype(in_dtype)
    whc = wh.astype(in_dtype)
    # biases stay f32 (added after the f32 accumulation).

    # ---- batch tiling: >= 2 grid steps when possible (v7x megacore), padding
    # bounded to one sublane group per tile, tiles capped at TB_MAX ----
    B8 = _round_up(B, 8)
    n_tiles = max(pl.cdiv(B8, TB_MAX), 2 if B8 >= 16 else 1)
    TB = _round_up(pl.cdiv(B8, n_tiles), 8)
    Bp = _round_up(B8, TB)

    xp = jnp.zeros((Bp, K_PAD), in_dtype).at[:B, :STATE_DIM].set(x.astype(in_dtype))

    const = lambda i: (0, 0)      # weights/biases stay VMEM-resident across steps
    batch_map = lambda i: (i, 0)

    head = pl.pallas_call(
        actor_kernel,
        out_shape=jax.ShapeDtypeStruct((Bp, HEAD_PAD), jnp.float32),
        grid=(Bp // TB,),
        in_specs=[
            pl.BlockSpec((TB, K_PAD), batch_map),         # x tile
            pl.BlockSpec((K_PAD, HIDDEN), const),         # w1 (padded)
            pl.BlockSpec((1, HIDDEN), const),             # b1
            pl.BlockSpec((HIDDEN, HIDDEN), const),        # w2
            pl.BlockSpec((1, HIDDEN), const),             # b2
            pl.BlockSpec((HIDDEN, HEAD_PAD), const),      # fused head W
            pl.BlockSpec((1, HEAD_PAD), const),           # fused head b
        ],
        out_specs=pl.BlockSpec((TB, HEAD_PAD), batch_map),
        compiler_params=pltpu.CompilerParams(
            dimension_semantics=("parallel",)),
    )(xp, w1p, b1, w2c, b2, whc, bh)

    # clip/exp on the tiny (B, 2) slices only (negligible XLA work).
    mu = head[:B, MU_OFF:MU_OFF + ACTION_DIM]
    log_std = jnp.clip(head[:B, LS_OFF:LS_OFF + ACTION_DIM], MIN_LOG_STD, MAX_LOG_STD)
    return mu, jnp.exp(log_std)


def init_params(key):
    """Deterministic init mirroring the PyTorch module's __init__ shapes.

    l1: Linear(52, 256), l2: Linear(256, 256),
    mu_head / log_std_head: Linear(256, 2) with uniform(-0.003, 0.003).
    Weights stored transposed as (in, out); biases as (1, out)."""
    k1, k2, k3, k4, k5, k6, k7, k8 = jax.random.split(key, 8)

    def linear_init(kw, kb, fan_in, fan_out):
        bound = 1.0 / jnp.sqrt(float(fan_in))
        w = jax.random.uniform(kw, (fan_in, fan_out), jnp.float32, -bound, bound)
        b = jax.random.uniform(kb, (1, fan_out), jnp.float32, -bound, bound)
        return w, b

    w1, b1 = linear_init(k1, k2, STATE_DIM, HIDDEN)
    w2, b2 = linear_init(k3, k4, HIDDEN, HIDDEN)

    init_w = 0.003
    wmu = jax.random.uniform(k5, (HIDDEN, ACTION_DIM), jnp.float32, -init_w, init_w)
    bmu = jax.random.uniform(k6, (1, ACTION_DIM), jnp.float32, -init_w, init_w)
    wls = jax.random.uniform(k7, (HIDDEN, ACTION_DIM), jnp.float32, -init_w, init_w)
    bls = jax.random.uniform(k8, (1, ACTION_DIM), jnp.float32, -init_w, init_w)

    return (w1, b1, w2, b2, wmu, bmu, wls, bls)


def reference_forward(x, params):
    w1, b1, w2, b2, wmu, bmu, wls, bls = params
    h1 = jnp.maximum(x @ w1 + b1, 0.0)
    h2 = jnp.maximum(h1 @ w2 + b2, 0.0)
    mu = h2 @ wmu + bmu
    log_std = jnp.clip(h2 @ wls + bls, MIN_LOG_STD, MAX_LOG_STD)
    return mu, jnp.exp(log_std)


if __name__ == "__main__":
    key = jax.random.PRNGKey(0)
    kp, kx1, kx2 = jax.random.split(key, 3)

    params = init_params(kp)
    fwd = jax.jit(actor_forward, static_argnames=("use_bf16",))

    # --- small-batch case (matches the original test: batch=8), f32 MXU path ---
    batch = 8
    x = jax.random.normal(kx1, (batch, STATE_DIM), dtype=jnp.float32)
    mu, std = fwd(x, params, use_bf16=False)
    jax.block_until_ready((mu, std))
    mu_ref, std_ref = reference_forward(x, params)
    assert mu.shape == (batch, ACTION_DIM) and std.shape == (batch, ACTION_DIM)
    assert jnp.allclose(mu, mu_ref, atol=1e-5, rtol=1e-5)
    assert jnp.allclose(std, std_ref, atol=1e-5, rtol=1e-5)

    # --- same batch, bf16-operand fast path (f32 accumulation) ---
    mu_b, std_b = fwd(x, params, use_bf16=True)
    jax.block_until_ready((mu_b, std_b))
    assert jnp.allclose(mu_b, mu_ref, atol=5e-3, rtol=1e-2)
    assert jnp.allclose(std_b, std_ref, atol=5e-3, rtol=1e-2)

    # --- non-multiple-of-8 batch exercises padding + 2-step grid (bf16 path) ---
    batch2 = 50
    x2 = jax.random.normal(kx2, (batch2, STATE_DIM), dtype=jnp.float32)
    mu2, std2 = fwd(x2, params, use_bf16=True)
    jax.block_until_ready((mu2, std2))
    mu2_ref, std2_ref = reference_forward(x2, params)
    assert mu2.shape == (batch2, ACTION_DIM) and std2.shape == (batch2, ACTION_DIM)
    assert jnp.allclose(mu2, mu2_ref, atol=5e-3, rtol=1e-2)
    assert jnp.allclose(std2, std2_ref, atol=5e-3, rtol=1e-2)

    print("KERNEL_OK")
</pallas_src>

<mosaic_0001>
module attributes {stable_mosaic.version = 11 : i64} {
  func.func @actor_kernel(%arg0: i32, %arg1: memref<8x64xf32, #tpu.memory_space<vmem>>, %arg2: memref<64x256xf32, #tpu.memory_space<vmem>>, %arg3: memref<1x256xf32, #tpu.memory_space<vmem>>, %arg4: memref<256x256xf32, #tpu.memory_space<vmem>>, %arg5: memref<1x256xf32, #tpu.memory_space<vmem>>, %arg6: memref<256x128xf32, #tpu.memory_space<vmem>>, %arg7: memref<1x128xf32, #tpu.memory_space<vmem>>, %arg8: memref<8x128xf32, #tpu.memory_space<vmem>>) attributes {dimension_semantics = [#tpu.dimension_semantics<parallel>], iteration_bounds = array<i64: 1>, scalar_prefetch = 0 : i64, scratch_operands = 0 : i64, tpu.core_type = #tpu.core_type<tc>, window_params = [{transform_indices = @transform_0, window_bounds = array<i64: 8, 64>}, {pipeline_mode = #tpu.pipeline_mode<synchronous>, transform_indices = @transform_1, window_bounds = array<i64: 64, 256>}, {pipeline_mode = #tpu.pipeline_mode<synchronous>, transform_indices = @transform_2, window_bounds = array<i64: 1, 256>}, {pipeline_mode = #tpu.pipeline_mode<synchronous>, transform_indices = @transform_3, window_bounds = array<i64: 256, 256>}, {pipeline_mode = #tpu.pipeline_mode<synchronous>, transform_indices = @transform_4, window_bounds = array<i64: 1, 256>}, {pipeline_mode = #tpu.pipeline_mode<synchronous>, transform_indices = @transform_5, window_bounds = array<i64: 256, 128>}, {pipeline_mode = #tpu.pipeline_mode<synchronous>, transform_indices = @transform_6, window_bounds = array<i64: 1, 128>}, {transform_indices = @transform_7, window_bounds = array<i64: 8, 128>}]} {
    %c0 = arith.constant 0 : index
    %c0_0 = arith.constant 0 : index
    %0 = vector.load %arg1[%c0, %c0_0] : memref<8x64xf32, #tpu.memory_space<vmem>>, vector<8x64xf32>
    %c0_1 = arith.constant 0 : index
    %c0_2 = arith.constant 0 : index
    %1 = vector.load %arg2[%c0_1, %c0_2] : memref<64x256xf32, #tpu.memory_space<vmem>>, vector<64x256xf32>
    %cst = arith.constant dense<0.000000e+00> : vector<8x256xf32>
    %2 = tpu.matmul %0, %1, %cst {dimension_numbers = #tpu.dot_dimension_numbers<[1], [0], [0], [1], [0, 0, 1, 1], [], []>} : vector<8x64xf32>, vector<64x256xf32>, vector<8x256xf32> -> vector<8x256xf32>
    %c0_3 = arith.constant 0 : index
    %c0_4 = arith.constant 0 : index
    %3 = vector.load %arg3[%c0_3, %c0_4] : memref<1x256xf32, #tpu.memory_space<vmem>>, vector<1x256xf32>
    %4 = vector.broadcast %3 : vector<1x256xf32> to vector<8x256xf32>
    %5 = arith.addf %2, %4 : vector<8x256xf32>
    %cst_5 = arith.constant 0.000000e+00 : f32
    %6 = vector.broadcast %cst_5 : f32 to vector<8x256xf32>
    %7 = arith.maximumf %5, %6 : vector<8x256xf32>
    %c0_6 = arith.constant 0 : index
    %c0_7 = arith.constant 0 : index
    %8 = vector.load %arg4[%c0_6, %c0_7] : memref<256x256xf32, #tpu.memory_space<vmem>>, vector<256x256xf32>
    %cst_8 = arith.constant dense<0.000000e+00> : vector<8x256xf32>
    %9 = tpu.matmul %7, %8, %cst_8 {dimension_numbers = #tpu.dot_dimension_numbers<[1], [0], [0], [1], [0, 0, 1, 1], [], []>} : vector<8x256xf32>, vector<256x256xf32>, vector<8x256xf32> -> vector<8x256xf32>
    %c0_9 = arith.constant 0 : index
    %c0_10 = arith.constant 0 : index
    %10 = vector.load %arg5[%c0_9, %c0_10] : memref<1x256xf32, #tpu.memory_space<vmem>>, vector<1x256xf32>
    %11 = vector.broadcast %10 : vector<1x256xf32> to vector<8x256xf32>
    %12 = arith.addf %9, %11 : vector<8x256xf32>
    %cst_11 = arith.constant 0.000000e+00 : f32
    %13 = vector.broadcast %cst_11 : f32 to vector<8x256xf32>
    %14 = arith.maximumf %12, %13 : vector<8x256xf32>
    %c0_12 = arith.constant 0 : index
    %c0_13 = arith.constant 0 : index
    %15 = vector.load %arg6[%c0_12, %c0_13] : memref<256x128xf32, #tpu.memory_space<vmem>>, vector<256x128xf32>
    %cst_14 = arith.constant dense<0.000000e+00> : vector<8x128xf32>
    %16 = tpu.matmul %14, %15, %cst_14 {dimension_numbers = #tpu.dot_dimension_numbers<[1], [0], [0], [1], [0, 0, 1, 1], [], []>} : vector<8x256xf32>, vector<256x128xf32>, vector<8x128xf32> -> vector<8x128xf32>
    %c0_15 = arith.constant 0 : index
    %c0_16 = arith.constant 0 : index
    %17 = vector.load %arg7[%c0_15, %c0_16] : memref<1x128xf32, #tpu.memory_space<vmem>>, vector<1x128xf32>
    %18 = vector.broadcast %17 : vector<1x128xf32> to vector<8x128xf32>
    %19 = arith.addf %16, %18 : vector<8x128xf32>
    %c0_17 = arith.constant 0 : index
    %c0_18 = arith.constant 0 : index
    %20 = vector.load %arg8[%c0_17, %c0_18] : memref<8x128xf32, #tpu.memory_space<vmem>>, vector<8x128xf32>
    tpu.vector_store %arg8[%c0_17, %c0_18], %19 {strides = array<i32>} : memref<8x128xf32, #tpu.memory_space<vmem>>, vector<8x128xf32>,
    return
  }
  func.func @transform_0(%arg0: i32) -> (i32, i32) {
    %c0_i32 = arith.constant 0 : i32
    %c0_i32_0 = arith.constant 0 : i32
    return %arg0, %c0_i32 : i32, i32
  }
  func.func @transform_1(%arg0: i32) -> (i32, i32) {
    %c0_i32 = arith.constant 0 : i32
    %c0_i32_0 = arith.constant 0 : i32
    %c0_i32_1 = arith.constant 0 : i32
    return %c0_i32, %c0_i32_0 : i32, i32
  }
  func.func @transform_2(%arg0: i32) -> (i32, i32) {
    %c0_i32 = arith.constant 0 : i32
    %c0_i32_0 = arith.constant 0 : i32
    %c0_i32_1 = arith.constant 0 : i32
    return %c0_i32, %c0_i32_0 : i32, i32
  }
  func.func @transform_3(%arg0: i32) -> (i32, i32) {
    %c0_i32 = arith.constant 0 : i32
    %c0_i32_0 = arith.constant 0 : i32
    %c0_i32_1 = arith.constant 0 : i32
    return %c0_i32, %c0_i32_0 : i32, i32
  }
  func.func @transform_4(%arg0: i32) -> (i32, i32) {
    %c0_i32 = arith.constant 0 : i32
    %c0_i32_0 = arith.constant 0 : i32
    %c0_i32_1 = arith.constant 0 : i32
    return %c0_i32, %c0_i32_0 : i32, i32
  }
  func.func @transform_5(%arg0: i32) -> (i32, i32) {
    %c0_i32 = arith.constant 0 : i32
    %c0_i32_0 = arith.constant 0 : i32
    %c0_i32_1 = arith.constant 0 : i32
    return %c0_i32, %c0_i32_0 : i32, i32
  }
  func.func @transform_6(%arg0: i32) -> (i32, i32) {
    %c0_i32 = arith.constant 0 : i32
    %c0_i32_0 = arith.constant 0 : i32
    %c0_i32_1 = arith.constant 0 : i32
    return %c0_i32, %c0_i32_0 : i32, i32
  }
  func.func @transform_7(%arg0: i32) -> (i32, i32) {
    %c0_i32 = arith.constant 0 : i32
    %c0_i32_0 = arith.constant 0 : i32
    return %arg0, %c0_i32 : i32, i32
  }
}

</mosaic_0001>

<bundles_post_ra>
// kernel: actor_forward.1
= control target key start
LH: loop header
LB: loop body
LE: loop exit
PB: predicated region body
PF: predicated region fallthrough
CT: control target
= control target key end

     0   :  { %v545_v3 = vmov 0.0   ;;  %vm55_vm0 = vcmask 523264   ;;  %s937_s1 = inlined_call_operand.vmem [shape: f32[64,256], index: 1, kind: input, shape index: {}]   ;;  %s938_s3 = inlined_call_operand.vmem [shape: f32[256,256], index: 3, kind: input, shape index: {}]   ;;  %s939_s0 = inlined_call_operand.vmem [shape: f32[8,64], index: 0, kind: input, shape index: {}]   ;;  %s940_s5 = inlined_call_operand.vmem [shape: f32[256,128], index: 5, kind: input, shape index: {}]   ;;  %s941_s2 = inlined_call_operand.vmem [shape: f32[1,256], index: 2, kind: input, shape index: {}]   ;;  %s942_s4 = inlined_call_operand.vmem [shape: f32[1,256], index: 4, kind: input, shape index: {}]   ;;  %s943_s6 = inlined_call_operand.vmem [shape: f32[1,128], index: 6, kind: input, shape index: {}]   ;;  %s944_s7 = inlined_call_operand.vmem [shape: f32[8,128], index: 7, kind: output, shape index: {}]  }
   0x1   :  { %v28_v0 = vld [vmem:[%s937_s1 + $0x8] sm:$0xff]  ;;  %v30_v1 = vld [vmem:[%s937_s1 + $0x18] sm:$0xff]  ;;  %v27_v2 = vld [vmem:[%s937_s1] sm:$0xff]  ;;  %123 = vmatprep.mubr.f32.mxu0 %v545_v3 }
   0x2   :  { %v432_v4 = vpack.c.bf16 %v30_v1, %v28_v0  ;;  %v29_v5 = vld [vmem:[%s937_s1 + $0x10] sm:$0xff]  ;;  %v32_v6 = vld [vmem:[%s937_s1 + $0x28] sm:$0xff]  ;;  %v34_v7 = vld [vmem:[%s937_s1 + $0x38] sm:$0xff] }
   0x3   :  { %v434_v8 = vpack.c.bf16 %v29_v5, %v27_v2  ;;  %v436_v9 = vpack.c.bf16 %v34_v7, %v32_v6  ;;  %v31_v10 = vld [vmem:[%s937_s1 + $0x20] sm:$0xff]  ;;  %v33_v11 = vld [vmem:[%s937_s1 + $0x30] sm:$0xff]  ;;  %v36_v12 = vld [vmem:[%s937_s1 + $0x48] sm:$0xff] }
   0x4   :  { %433 = vmatprep.subr.bf16.mxu0 %v432_v4  ;;  %v38_v13 = vld [vmem:[%s937_s1 + $0x58] sm:$0xff]  ;;  %v438_v14 = vpack.c.bf16 %v33_v11, %v31_v10  ;;  %v35_v15 = vld [vmem:[%s937_s1 + $0x40] sm:$0xff]  ;;  %v37_v16 = vld [vmem:[%s937_s1 + $0x50] sm:$0xff] }
   0x5   :  { %435 = vmatpush1.bf16.msra.mxu0 %v434_v8  ;;  %v440_v17 = vpack.c.bf16 %v38_v13, %v36_v12  ;;  %v40_v18 = vld [vmem:[%s937_s1 + $0x68] sm:$0xff]  ;;  %v42_v19 = vld [vmem:[%s937_s1 + $0x78] sm:$0xff]  ;;  %v132_v22 = vld [vmem:[%s938_s3] sm:$0xff]  ;;  %v442_v29 = vpack.c.bf16 %v37_v16, %v35_v15 }
   0x6   :  { %437 = vmatprep.subr.bf16.mxu0 %v436_v9  ;;  %v133_v20 = vld [vmem:[%s938_s3 + $0x8] sm:$0xff]  ;;  %v135_v21 = vld [vmem:[%s938_s3 + $0x18] sm:$0xff]  ;;  %v134_v23 = vld [vmem:[%s938_s3 + $0x10] sm:$0xff]  ;;  %v444_v34 = vpack.c.bf16 %v42_v19, %v40_v18 }
   0x7   :  { %v448_v24 = vpack.c.bf16 %v135_v21, %v133_v20  ;;  %v450_v25 = vpack.c.bf16 %v134_v23, %v132_v22  ;;  %v137_v26 = vld [vmem:[%s938_s3 + $0x28] sm:$0xff]  ;;  %v139_v27 = vld [vmem:[%s938_s3 + $0x38] sm:$0xff]  ;;  %v136_v28 = vld [vmem:[%s938_s3 + $0x20] sm:$0xff] }
   0x8   :  { %v452_v30 = vpack.c.bf16 %v139_v27, %v137_v26  ;;  %v138_v31 = vld [vmem:[%s938_s3 + $0x30] sm:$0xff]  ;;  %v141_v32 = vld [vmem:[%s938_s3 + $0x48] sm:$0xff]  ;;  %v143_v33 = vld [vmem:[%s938_s3 + $0x58] sm:$0xff] }
   0x9   :  { %439 = vmatpush1.bf16.msra.mxu0 %v438_v14  ;;  %v39_v35 = vld [vmem:[%s937_s1 + $0x60] sm:$0xff]  ;;  %v41_v36 = vld [vmem:[%s937_s1 + $0x70] sm:$0xff]  ;;  %449 = vmatprep.subr.bf16.mxu1 %v448_v24  ;;  %v454_v37 = vpack.c.bf16 %v138_v31, %v136_v28  ;;  %v456_v38 = vpack.c.bf16 %v143_v33, %v141_v32  ;;  %v145_v42 = vld [vmem:[%s938_s3 + $0x68] sm:$0xff] }
   0xa   :  { %441 = vmatprep.subr.bf16.mxu0 %v440_v17  ;;  %451 = vmatpush1.bf16.msra.mxu1 %v450_v25  ;;  %v140_v39 = vld [vmem:[%s938_s3 + $0x40] sm:$0xff]  ;;  %v142_v40 = vld [vmem:[%s938_s3 + $0x50] sm:$0xff]  ;;  %v446_v41 = vpack.c.bf16 %v41_v36, %v39_v35  ;;  %v147_v43 = vld [vmem:[%s938_s3 + $0x78] sm:$0xff] }
   0xb   :  { %453 = vmatprep.subr.bf16.mxu1 %v452_v30  ;;  %v458_v44 = vpack.c.bf16 %v142_v40, %v140_v39  ;;  %v460_v45 = vpack.c.bf16 %v147_v43, %v145_v42  ;;  %v144_v46 = vld [vmem:[%s938_s3 + $0x60] sm:$0xff]  ;;  %v146_v47 = vld [vmem:[%s938_s3 + $0x70] sm:$0xff]  ;;  %v149_v49 = vld [vmem:[%s938_s3 + $0x88] sm:$0xff] }
   0xc   :  { %v26_v48 = vld [vmem:[%s939_s0] sm:$0xff]  ;;  %v151_v50 = vld [vmem:[%s938_s3 + $0x98] sm:$0xff]  ;;  %v462_v51 = vpack.c.bf16 %v146_v47, %v144_v46  ;;  %v150_v54 = vld [vmem:[%s938_s3 + $0x90] sm:$0xff] }
   0xd   :  { %443 = vmatpush1.bf16.msra.mxu0 %v442_v29  ;;  %v464_v52 = vpack.c.bf16 %v151_v50, %v149_v49  ;;  %v148_v53 = vld [vmem:[%s938_s3 + $0x80] sm:$0xff]  ;;  %v153_v55 = vld [vmem:[%s938_s3 + $0xa8] sm:$0xff]  ;;  %v155_v56 = vld [vmem:[%s938_s3 + $0xb8] sm:$0xff] }
   0xe   :  { %445 = vmatprep.subr.bf16.mxu0 %v444_v34  ;;  %455 = vmatpush1.bf16.msra.mxu1 %v454_v37  ;;  %v466_v57 = vpack.c.bf16 %v150_v54, %v148_v53  ;;  %v468_v58 = vpack.c.bf16 %v155_v56, %v153_v55  ;;  %v152_v59 = vld [vmem:[%s938_s3 + $0xa0] sm:$0xff]  ;;  %v154_v60 = vld [vmem:[%s938_s3 + $0xb0] sm:$0xff]  ;;  %v157_v61 = vld [vmem:[%s938_s3 + $0xc8] sm:$0xff] }
   0xf   :  { %457 = vmatprep.subr.bf16.mxu1 %v456_v38  ;;  %v159_v62 = vld [vmem:[%s938_s3 + $0xd8] sm:$0xff]  ;;  %v470_v63 = vpack.c.bf16 %v154_v60, %v152_v59  ;;  %v156_v1 = vld [vmem:[%s938_s3 + $0xc0] sm:$0xff]  ;;  %v158_v2 = vld [vmem:[%s938_s3 + $0xd0] sm:$0xff] }
  0x10   :  { %v472_v0 = vpack.c.bf16 %v159_v62, %v157_v61  ;;  %v161_v3 = vld [vmem:[%s938_s3 + $0xe8] sm:$0xff]  ;;  %v163_v4 = vld [vmem:[%s938_s3 + $0xf8] sm:$0xff]  ;;  %v474_v5 = vpack.c.bf16 %v158_v2, %v156_v1  ;;  %v160_v7 = vld [vmem:[%s938_s3 + $0xe0] sm:$0xff] }
  0x11   :  { %447 = vmatpush1.bf16.msra.mxu0 %v446_v41  ;;  %v476_v6 = vpack.c.bf16 %v163_v4, %v161_v3  ;;  %v162_v8 = vld [vmem:[%s938_s3 + $0xf0] sm:$0xff]  ;;  %v165_v9 = vld [vmem:[%s938_s3 + $0x108] sm:$0xff]  ;;  %v167_v10 = vld [vmem:[%s938_s3 + $0x118] sm:$0xff] }
  0x12   :  { %459 = vmatpush1.bf16.msra.mxu1 %v458_v44  ;;  %v478_v11 = vpack.c.bf16 %v162_v8, %v160_v7  ;;  %v480_v12 = vpack.c.bf16 %v167_v10, %v165_v9  ;;  %v164_v13 = vld [vmem:[%s938_s3 + $0x100] sm:$0xff]  ;;  %v166_v14 = vld [vmem:[%s938_s3 + $0x110] sm:$0xff]  ;;  %v169_v15 = vld [vmem:[%s938_s3 + $0x128] sm:$0xff] }
  0x13   :  { %461 = vmatprep.subr.bf16.mxu1 %v460_v45  ;;  %v171_v16 = vld [vmem:[%s938_s3 + $0x138] sm:$0xff]  ;;  %v482_v17 = vpack.c.bf16 %v166_v14, %v164_v13  ;;  %v168_v19 = vld [vmem:[%s938_s3 + $0x120] sm:$0xff]  ;;  %v170_v20 = vld [vmem:[%s938_s3 + $0x130] sm:$0xff] }
  0x14   :  { %395 = vmatmul.mubr.msk.f32.vlgmr.msra.gmra.mrb[0].mxu0 %vm55_vm0, %v26_v48  ;;  %v484_v18 = vpack.c.bf16 %v171_v16, %v169_v15  ;;  %v173_v21 = vld [vmem:[%s938_s3 + $0x148] sm:$0xff]  ;;  %v175_v22 = vld [vmem:[%s938_s3 + $0x158] sm:$0xff]  ;;  %v486_v23 = vpack.c.bf16 %v170_v20, %v168_v19  ;;  %v172_v25 = vld [vmem:[%s938_s3 + $0x140] sm:$0xff] }
  0x15   :  { %v488_v24 = vpack.c.bf16 %v175_v22, %v173_v21  ;;  %v174_v26 = vld [vmem:[%s938_s3 + $0x150] sm:$0xff]  ;;  %v177_v27 = vld [vmem:[%s938_s3 + $0x168] sm:$0xff]  ;;  %v179_v28 = vld [vmem:[%s938_s3 + $0x178] sm:$0xff] }
  0x16   :  { %463 = vmatpush1.bf16.msra.mxu1 %v462_v51  ;;  %v490_v29 = vpack.c.bf16 %v174_v26, %v172_v25  ;;  %v492_v30 = vpack.c.bf16 %v179_v28, %v177_v27  ;;  %v176_v31 = vld [vmem:[%s938_s3 + $0x160] sm:$0xff]  ;;  %v178_v32 = vld [vmem:[%s938_s3 + $0x170] sm:$0xff]  ;;  %v181_v33 = vld [vmem:[%s938_s3 + $0x188] sm:$0xff] }
  0x17   :  { %465 = vmatprep.subr.bf16.mxu1 %v464_v52  ;;  %v183_v34 = vld [vmem:[%s938_s3 + $0x198] sm:$0xff]  ;;  %v494_v35 = vpack.c.bf16 %v178_v32, %v176_v31  ;;  %v180_v37 = vld [vmem:[%s938_s3 + $0x180] sm:$0xff]  ;;  %v182_v38 = vld [vmem:[%s938_s3 + $0x190] sm:$0xff] }
  0x18   :  { %v496_v36 = vpack.c.bf16 %v183_v34, %v181_v33  ;;  %v185_v39 = vld [vmem:[%s938_s3 + $0x1a8] sm:$0xff]  ;;  %v187_v40 = vld [vmem:[%s938_s3 + $0x1b8] sm:$0xff]  ;;  %v498_v41 = vpack.c.bf16 %v182_v38, %v180_v37  ;;  %v184_v43 = vld [vmem:[%s938_s3 + $0x1a0] sm:$0xff]  ;;  %v45_v33 = vlaneseq }
  0x19   :  { %v500_v42 = vpack.c.bf16 %v187_v40, %v185_v39  ;;  %v186_v44 = vld [vmem:[%s938_s3 + $0x1b0] sm:$0xff]  ;;  %v189_v45 = vld [vmem:[%s938_s3 + $0x1c8] sm:$0xff]  ;;  %v191_v46 = vld [vmem:[%s938_s3 + $0x1d8] sm:$0xff] }
  0x1a   :  { %467 = vmatpush1.bf16.msra.mxu1 %v466_v57  ;;  %v502_v47 = vpack.c.bf16 %v186_v44, %v184_v43  ;;  %v504_v48 = vpack.c.bf16 %v191_v46, %v189_v45  ;;  %v188_v49 = vld [vmem:[%s938_s3 + $0x1c0] sm:$0xff]  ;;  %v190_v50 = vld [vmem:[%s938_s3 + $0x1d0] sm:$0xff]  ;;  %v193_v52 = vld [vmem:[%s938_s3 + $0x1e8] sm:$0xff]  ;;  %v46_v34 = vshrl.u32 %v45_v33, 7 }
  0x1b   :  { %469 = vmatprep.subr.bf16.mxu1 %v468_v58  ;;  %v506_v51 = vpack.c.bf16 %v190_v50, %v188_v49  ;;  %v195_v53 = vld [vmem:[%s938_s3 + $0x1f8] sm:$0xff]  ;;  %v192_v55 = vld [vmem:[%s938_s3 + $0x1e0] sm:$0xff]  ;;  %v194_v56 = vld [vmem:[%s938_s3 + $0x1f0] sm:$0xff] }
  0x1c   :  { %v508_v54 = vpack.c.bf16 %v195_v53, %v193_v52  ;;  %v510_v57 = vpack.c.bf16 %v194_v56, %v192_v55  ;;  %v297_v58 = vld [vmem:[%s940_s5 + $0x80] sm:$0xff]  ;;  %v298_v59 = vld [vmem:[%s940_s5 + $0x88] sm:$0xff]  ;;  %v283_v3 = vld [vmem:[%s940_s5 + $0x10] sm:$0xff]  ;;  %v51_v37 = vsub.s32 1, %v46_v34 }
  0x1d   :  { %v281_v60 = vld [vmem:[%s940_s5] sm:$0xff]  ;;  %v512_v61 = vpack.c.bf16 %v298_v59, %v297_v58  ;;  %v282_v62 = vld [vmem:[%s940_s5 + $0x8] sm:$0xff]  ;;  %v284_v4 = vld [vmem:[%s940_s5 + $0x18] sm:$0xff] }
  0x1e   :  { %471 = vmatpush1.bf16.msra.mxu1 %v470_v63  ;;  %v299_v63 = vld [vmem:[%s940_s5 + $0x90] sm:$0xff]  ;;  %v514_v1 = vpack.c.bf16 %v282_v62, %v281_v60  ;;  %v518_v7 = vpack.c.bf16 %v284_v4, %v283_v3  ;;  %v285_v9 = vld [vmem:[%s940_s5 + $0x20] sm:$0xff]  ;;  %v286_v10 = vld [vmem:[%s940_s5 + $0x28] sm:$0xff] }
  0x1f   :  { %473 = vmatprep.subr.bf16.mxu1 %v472_v0  ;;  %v300_v0 = vld [vmem:[%s940_s5 + $0x98] sm:$0xff]  ;;  %513 = vmatprep.subr.bf16.mxu0 %v512_v61  ;;  %v522_v13 = vpack.c.bf16 %v286_v10, %v285_v9  ;;  %v287_v15 = vld [vmem:[%s940_s5 + $0x30] sm:$0xff]  ;;  %v289_v21 = vld [vmem:[%s940_s5 + $0x40] sm:$0xff] }
  0x20   :  { %v516_v2 = vpack.c.bf16 %v300_v0, %v299_v63  ;;  %515 = vmatpush3.bf16.msra.mxu0 %v514_v1  ;;  %v288_v16 = vld [vmem:[%s940_s5 + $0x38] sm:$0xff]  ;;  %v290_v22 = vld [vmem:[%s940_s5 + $0x48] sm:$0xff]  ;;  %v291_v27 = vld [vmem:[%s940_s5 + $0x50] sm:$0xff] }
  0x21   :  { %v526_v19 = vpack.c.bf16 %v288_v16, %v287_v15  ;;  %v530_v25 = vpack.c.bf16 %v290_v22, %v289_v21  ;;  %v292_v28 = vld [vmem:[%s940_s5 + $0x58] sm:$0xff]  ;;  %v293_v46 = vld [vmem:[%s940_s5 + $0x60] sm:$0xff]  ;;  %v311_v49 = vld [vmem:[%s940_s5 + $0xf0] sm:$0xff] }
  0x22   :  { %475 = vmatpush1.bf16.msra.mxu1 %v474_v5  ;;  %v301_v5 = vld [vmem:[%s940_s5 + $0xa0] sm:$0xff]  ;;  %517 = vmatprep.subr.bf16.mxu0 %v516_v2  ;;  %v534_v31 = vpack.c.bf16 %v292_v28, %v291_v27  ;;  %v312_v50 = vld [vmem:[%s940_s5 + $0xf8] sm:$0xff]  ;;  %v295_v52 = vld [vmem:[%s940_s5 + $0x70] sm:$0xff] }
  0x23   :  { %477 = vmatprep.subr.bf16.mxu1 %v476_v6  ;;  %v302_v6 = vld [vmem:[%s940_s5 + $0xa8] sm:$0xff]  ;;  %v296_v53 = vld [vmem:[%s940_s5 + $0x78] sm:$0xff]  ;;  %v196_v55 = vld [vmem:[%s942_s4] sm:$0x3] }
  0x24   :  { %v520_v8 = vpack.c.bf16 %v302_v6, %v301_v5  ;;  %519 = vmatpush3.bf16.msra.mxu0 %v518_v7  ;;  %v396_v1 = vld [vmem:[%s943_s6] ss:$0 sm:$0xff] }
  0x26   :  { %479 = vmatpush1.bf16.msra.mxu1 %v478_v11  ;;  %v303_v11 = vld [vmem:[%s940_s5 + $0xb0] sm:$0xff]  ;;  %521 = vmatprep.subr.bf16.mxu0 %v520_v8 }
  0x27   :  { %481 = vmatprep.subr.bf16.mxu1 %v480_v12  ;;  %v304_v12 = vld [vmem:[%s940_s5 + $0xb8] sm:$0xff] }
  0x28   :  { %v524_v14 = vpack.c.bf16 %v304_v12, %v303_v11  ;;  %523 = vmatpush3.bf16.msra.mxu0 %v522_v13 }
  0x2a   :  { %483 = vmatpush1.bf16.msra.mxu1 %v482_v17  ;;  %v305_v17 = vld [vmem:[%s940_s5 + $0xc0] sm:$0xff]  ;;  %525 = vmatprep.subr.bf16.mxu0 %v524_v14 }
  0x2b   :  { %485 = vmatprep.subr.bf16.mxu1 %v484_v18  ;;  %v306_v18 = vld [vmem:[%s940_s5 + $0xc8] sm:$0xff] }
  0x2c   :  { %v528_v20 = vpack.c.bf16 %v306_v18, %v305_v17  ;;  %527 = vmatpush3.bf16.msra.mxu0 %v526_v19 }
  0x2e   :  { %487 = vmatpush1.bf16.msra.mxu1 %v486_v23  ;;  %v307_v23 = vld [vmem:[%s940_s5 + $0xd0] sm:$0xff]  ;;  %529 = vmatprep.subr.bf16.mxu0 %v528_v20 }
  0x2f   :  { %489 = vmatprep.subr.bf16.mxu1 %v488_v24  ;;  %v308_v24 = vld [vmem:[%s940_s5 + $0xd8] sm:$0xff] }
  0x30   :  { %v532_v26 = vpack.c.bf16 %v308_v24, %v307_v23  ;;  %531 = vmatpush3.bf16.msra.mxu0 %v530_v25 }
  0x32   :  { %491 = vmatpush1.bf16.msra.mxu1 %v490_v29  ;;  %v309_v29 = vld [vmem:[%s940_s5 + $0xe0] sm:$0xff]  ;;  %533 = vmatprep.subr.bf16.mxu0 %v532_v26 }
  0x33   :  { %493 = vmatprep.subr.bf16.mxu1 %v492_v30  ;;  %v310_v30 = vld [vmem:[%s940_s5 + $0xe8] sm:$0xff] }
  0x34   :  { %v536_v32 = vpack.c.bf16 %v310_v30, %v309_v29  ;;  %535 = vmatpush3.bf16.msra.mxu0 %v534_v31 }
  0x36   :  { %495 = vmatpush1.bf16.msra.mxu1 %v494_v35  ;;  %537 = vmatprep.subr.bf16.mxu0 %v536_v32  ;;  %v47_v35 = vsub.s32 0, %v46_v34 }
  0x37   :  { %497 = vmatprep.subr.bf16.mxu1 %v496_v36  ;;  %v43_v36 = vld [vmem:[%s941_s2] sm:$0x3] }
  0x38   :  { %v48_v38 = vrot.slane %v43_v36, %v47_v35  ;;  %v52_v39 = vrot.slane %v43_v36, %v51_v37  ;;  %v201_v56 = vrot.slane %v196_v55, %v47_v35 }
  0x3a   :  { %499 = vmatpush1.bf16.msra.mxu1 %v498_v41 }
  0x3b   :  { %501 = vmatprep.subr.bf16.mxu1 %v500_v42 }
  0x3e   :  { %503 = vmatpush1.bf16.msra.mxu1 %v502_v47  ;;  %v294_v47 = vld [vmem:[%s940_s5 + $0x68] sm:$0xff] }
  0x3f   :  { %505 = vmatprep.subr.bf16.mxu1 %v504_v48  ;;  %v538_v48 = vpack.c.bf16 %v294_v47, %v293_v46 }
  0x41   :  { %539 = vmatpush3.bf16.msra.mxu0 %v538_v48 }
  0x42   :  { %507 = vmatpush1.bf16.msra.mxu1 %v506_v51  ;;  %v540_v51 = vpack.c.bf16 %v312_v50, %v311_v49 }
  0x43   :  { %509 = vmatprep.subr.bf16.mxu1 %v508_v54  ;;  %v542_v54 = vpack.c.bf16 %v296_v53, %v295_v52 }
  0x44   :  { %541 = vmatprep.subr.bf16.mxu0 %v540_v51 }
  0x45   :  { %543 = vmatpush3.bf16.msra.mxu0 %v542_v54 }
  0x46   :  { %511 = vmatpush1.bf16.msra.mxu1 %v510_v57  ;;  %v205_v57 = vrot.slane %v196_v55, %v51_v37 }
  0xe7   :  { %v125_v40 = vpop.f32.mrb[0].mxu0 }
  0xe8   :  { %v126_v41 = vadd.f32 %v125_v40, %v48_v38  ;;  %v127_v42 = vpop.f32.mrb[1].mxu0 }
  0xe9   :  { %v128_v43 = vadd.f32 %v127_v42, %v52_v39 }
  0xea   :  { %v130_v45 = vmax.f32 %v126_v41, 0.0 }
  0xeb   :  { %v131_v44 = vmax.f32 %v128_v43, 0.0 }
  0xed   :  { %272 = vmatprep.mubr.f32.mxu1 %v131_v44 }
  0xee   :  { %273 = vmatmul.mubr.f32.vlgmr.msra.gmra.mrb[0].mxu1 %v130_v45 }
 0x1c1   :  { %v274_v58 = vpop.f32.mrb[0].mxu1 }
 0x1c2   :  { %v275_v59 = vadd.f32 %v274_v58, %v201_v56  ;;  %v276_v60 = vpop.f32.mrb[1].mxu1 }
 0x1c3   :  { %v277_v61 = vadd.f32 %v276_v60, %v205_v57 }
 0x1c4   :  { %v279_v63 = vmax.f32 %v275_v59, 0.0 }
 0x1c5   :  { %v280_v62 = vmax.f32 %v277_v61, 0.0 }
 0x1c7   :  { %384 = vmatprep.mubr.f32.mxu0 %v280_v62 }
 0x1c8   :  { %385 = vmatmul.mubr.f32.vlgmr.msra.gmra.mrb[2].mxu0 %v279_v63 }
 0x29b   :  { %v429_v0 = vpop.f32.mrb[2].mxu0 }
 0x29c   :  { %v430_v2 = vpop.f32.mrb[3].mxu0 }
 0x29d   :  { %v431_v3 = vadd.f32 %v430_v2, %v429_v0 }
 0x29f   :  { %v387_v4 = vadd.f32 %v431_v3, %v396_v1 }
 0x2a1   :  { %390 = vst [vmem:[%s944_s7] sm:$0xff] %v387_v4 }

</bundles_post_ra>
